<compile_context>
chip_gen: v7x
topology: tpu7x:2x2x1
jax: 0.10.0
libtpu: 0.0.40
codegen_flags: <defaults>
</compile_context>

<pallas_src>
import functools

import jax
import jax.numpy as jnp
from jax.experimental import pallas as pl
from jax.experimental.pallas import tpu as pltpu


# --------------------------------------------------------------------------
# Chip detection (trace-time, best effort)
# --------------------------------------------------------------------------
def _device_kind() -> str:
    try:
        return jax.devices()[0].device_kind.lower()
    except Exception:
        return ""


_KIND = _device_kind()
_IS_V7 = "v7" in _KIND
_HAS_BF16_VPU = ("v6" in _KIND) or ("v7" in _KIND)   # v5e lacks bf16 VPU/EUP
_NUM_TC = 2 if _IS_V7 else 1                          # v7x: 2 TensorCores/chip

_LANE = 128
_TARGET_BLOCK_BYTES = (8 if _IS_V7 else 4) * 1024 * 1024   # input bytes / step
_VMEM_LIMIT_BYTES = (48 if _IS_V7 else 32) * 1024 * 1024


# --------------------------------------------------------------------------
# Kernel: 2*sigmoid(x) == 1 + tanh(0.5*x)
# --------------------------------------------------------------------------
def _act_kernel(x_ref, o_ref, *, compute_dtype):
    xc = x_ref[...].astype(compute_dtype)
    o_ref[...] = (1.0 + jnp.tanh(0.5 * xc)).astype(o_ref.dtype)


# --------------------------------------------------------------------------
# Wrapper helpers
# --------------------------------------------------------------------------
def _cdiv(a: int, b: int) -> int:
    return (a + b - 1) // b


def _min_sublane(dtype) -> int:
    # Minimum sublane tile: 8 for 4-byte, 16 for 2-byte, 32 for 1-byte dtypes.
    itemsize = jnp.dtype(dtype).itemsize
    return max(8, 32 // max(1, itemsize))


def _compute_dtype(dtype):
    if dtype == jnp.bfloat16 and _HAS_BF16_VPU:
        return jnp.bfloat16
    return jnp.float32


def _choose_lane_width(n: int) -> int:
    for w in (8192, 4096, 2048, 1024, 512, 256, 128):
        if n % w == 0:
            return w
    return _LANE


def _choose_block_rows(rows: int, sub: int, itemsize: int, lane_w: int) -> int:
    """Block row count: multiple of `sub`, ~_TARGET_BLOCK_BYTES of input,
    and (on multi-TC chips) a step count that is a balanced multiple of the
    TensorCore count."""
    if rows <= sub:
        # Block equals the full sublane extent of the array (always legal).
        return rows
    target_rows = max(sub, _TARGET_BLOCK_BYTES // (lane_w * itemsize))
    rb = max(sub, (min(target_rows, rows) // sub) * sub)
    if _NUM_TC > 1:
        # Round step count up to a multiple of the TC count and rebalance so
        # every step is ~equal (avoids one TC idling on a tiny trailing block
        # and guarantees both TCs get work).
        steps = max(_NUM_TC, _cdiv(_cdiv(rows, rb), _NUM_TC) * _NUM_TC)
        rb = max(sub, _cdiv(_cdiv(rows, steps), sub) * sub)
    return rb


def _run_2d(x2d: jax.Array, donate: bool = False) -> jax.Array:
    rows, lane_w = x2d.shape
    dtype = x2d.dtype
    itemsize = jnp.dtype(dtype).itemsize
    sub = _min_sublane(dtype)
    row_block = _choose_block_rows(rows, sub, itemsize, lane_w)
    grid = (_cdiv(rows, row_block),)

    kernel = functools.partial(_act_kernel, compute_dtype=_compute_dtype(dtype))
    return pl.pallas_call(
        kernel,
        out_shape=jax.ShapeDtypeStruct((rows, lane_w), dtype),
        grid_spec=pltpu.PrefetchScalarGridSpec(
            num_scalar_prefetch=0,
            grid=grid,
            in_specs=[pl.BlockSpec((row_block, lane_w), lambda i: (i, 0))],
            out_specs=pl.BlockSpec((row_block, lane_w), lambda i: (i, 0)),
        ),
        compiler_params=pltpu.CompilerParams(
            dimension_semantics=("parallel",),
            vmem_limit_bytes=_VMEM_LIMIT_BYTES,
        ),
        input_output_aliases=({0: 0} if donate else {}),
    )(x2d)


def act_op(x: jax.Array, donate: bool = False) -> jax.Array:
    """Elementwise 2*sigmoid(x) via a Pallas TPU kernel (floating dtypes).

    `donate=True` aliases the output onto the input HBM buffer (footprint win
    only; pass a donated/jit-donated array for it to take effect)."""
    if not jnp.issubdtype(x.dtype, jnp.floating):
        # Matches PyTorch: F.sigmoid is only defined for floating tensors.
        raise TypeError(f"act_op requires a floating dtype, got {x.dtype}")
    if x.dtype == jnp.float64:
        raise TypeError("float64 is not supported on TPU; cast to float32 first")

    orig_shape = x.shape
    n = x.size
    if n == 0:
        return x

    # ---- Fast path: size divisible by 128 -> zero-copy lane-dense slab. ----
    if n % _LANE == 0:
        lane_w = _choose_lane_width(n)
        x2d = x.reshape(n // lane_w, lane_w)         # free reshape (contiguous)
        return _run_2d(x2d, donate).reshape(orig_shape)   # free reshape

    # ---- Ragged path: kernel on the 128-aligned prefix, XLA on the tail. ----
    flat = x.reshape(-1)
    n_main = (n // _LANE) * _LANE
    cdt = _compute_dtype(x.dtype)
    parts = []
    if n_main:
        lane_w = _choose_lane_width(n_main)
        main = _run_2d(flat[:n_main].reshape(n_main // lane_w, lane_w))
        parts.append(main.reshape(-1))
    tail = flat[n_main:]                              # < 128 elements
    parts.append((1.0 + jnp.tanh(0.5 * tail.astype(cdt))).astype(x.dtype))
    return jnp.concatenate(parts).reshape(orig_shape)


# --------------------------------------------------------------------------
# Self-test
# --------------------------------------------------------------------------
if __name__ == "__main__":
    key = jax.random.PRNGKey(0)
    k1, k2, k3 = jax.random.split(key, 3)

    # NCHW input matching the PyTorch module: batch=2, channels=4, 16x16.
    x = jax.random.normal(k1, (2, 4, 16, 16), dtype=jnp.float32)
    y = jax.block_until_ready(act_op(x))
    y_ref = 2.0 * jax.nn.sigmoid(x)
    assert y.shape == x.shape and y.dtype == x.dtype
    assert jnp.max(jnp.abs(y - y_ref)) < 1e-5

    # Ragged-size input (size not a multiple of 128): aligned-prefix kernel +
    # tiny XLA tail, no full-array pad/slice passes.
    x2 = jax.random.normal(k2, (3, 5, 7, 11), dtype=jnp.float32)
    y2 = jax.block_until_ready(act_op(x2))
    y2_ref = 2.0 * jax.nn.sigmoid(x2)
    assert y2.shape == x2.shape and y2.dtype == x2.dtype
    assert jnp.max(jnp.abs(y2 - y2_ref)) < 1e-5

    # bf16 path (native bf16 compute on v6e/v7x, f32 upcast elsewhere).
    x3 = jax.random.normal(k3, (2, 4, 16, 16), dtype=jnp.bfloat16)
    y3 = jax.block_until_ready(act_op(x3))
    y3_ref = (2.0 * jax.nn.sigmoid(x3.astype(jnp.float32))).astype(jnp.bfloat16)
    assert y3.shape == x3.shape and y3.dtype == x3.dtype
    assert jnp.max(jnp.abs(y3.astype(jnp.float32) - y3_ref.astype(jnp.float32))) < 2e-2

    print("KERNEL_OK")
</pallas_src>

<mosaic_0001>
module attributes {stable_mosaic.version = 11 : i64} {
  func.func @_act_kernel(%arg0: i32, %arg1: memref<1x2048xf32, #tpu.memory_space<vmem>>, %arg2: memref<1x2048xf32, #tpu.memory_space<vmem>>) attributes {dimension_semantics = [#tpu.dimension_semantics<parallel>], iteration_bounds = array<i64: 1>, scalar_prefetch = 0 : i64, scratch_operands = 0 : i64, tpu.core_type = #tpu.core_type<tc>, window_params = [{transform_indices = @transform_0, window_bounds = array<i64: 1, 2048>}, {transform_indices = @transform_1, window_bounds = array<i64: 1, 2048>}]} {
    %c0 = arith.constant 0 : index
    %c0_0 = arith.constant 0 : index
    %0 = vector.load %arg1[%c0, %c0_0] : memref<1x2048xf32, #tpu.memory_space<vmem>>, vector<1x2048xf32>
    %cst = arith.constant 5.000000e-01 : f32
    %1 = vector.broadcast %cst : f32 to vector<1x2048xf32>
    %2 = arith.mulf %1, %0 : vector<1x2048xf32>
    %3 = math.tanh %2 : vector<1x2048xf32>
    %cst_1 = arith.constant 1.000000e+00 : f32
    %4 = vector.broadcast %cst_1 : f32 to vector<1x2048xf32>
    %5 = arith.addf %4, %3 : vector<1x2048xf32>
    %c0_2 = arith.constant 0 : index
    %c0_3 = arith.constant 0 : index
    %6 = vector.load %arg2[%c0_2, %c0_3] : memref<1x2048xf32, #tpu.memory_space<vmem>>, vector<1x2048xf32>
    tpu.vector_store %arg2[%c0_2, %c0_3], %5 {strides = array<i32>} : memref<1x2048xf32, #tpu.memory_space<vmem>>, vector<1x2048xf32>,
    return
  }
  func.func @transform_0(%arg0: i32) -> (i32, i32) {
    %c0_i32 = arith.constant 0 : i32
    %c0_i32_0 = arith.constant 0 : i32
    return %arg0, %c0_i32 : i32, i32
  }
  func.func @transform_1(%arg0: i32) -> (i32, i32) {
    %c0_i32 = arith.constant 0 : i32
    %c0_i32_0 = arith.constant 0 : i32
    return %arg0, %c0_i32 : i32, i32
  }
}

</mosaic_0001>

<bundles_post_ra>
// kernel: tpu_custom_call.1
= control target key start
LH: loop header
LB: loop body
LE: loop exit
PB: predicated region body
PF: predicated region fallthrough
CT: control target
= control target key end

     0   :  { %6 = vsyncpa [#allocation3], 0  ;;  %s136_s0 = inlined_call_operand.hbm [shape: f32[1,2048], index: 0, kind: input, shape index: {}]   ;;  %s137_s1 = inlined_call_operand.hbm [shape: f32[1,2048], index: 1, kind: output, shape index: {}]  }
   0x1   :  { %7 = vsyncpa [#allocation4], 0  ;;  %s100_s6 = smov [#allocation2]   ;;  %s52_s10 = scalar_lea.hbm %s136_s0, 256 }
   0x2   :  { %s14_s7 = sshll.u32 %s100_s6, 4  ;;  %p53_p0 = scmp.ne.s32.totalorder %s136_s0, %s52_s10  ;;  %s15_s7 = int_to_ptr.vmem [resolvable:$true] %s14_s7 }
   0x3   :  { %p56_p1 = scmp.lt.u32.totalorder %s52_s10, %s136_s0 }
   0x5   :  { %p58_p2 = pnand %p56_p1, %p53_p0 }
   0x7   :  { %61 = shalt.err (!%p58_p2)
}
   0x8   :  { %s62_s15 = scalar_lea.vmem %s15_s7, 256  ;;  %p67_p4 = scmp.lt.s32.totalorder %s15_s7, %s15_s7 }
   0x9   :  { %p63_p3 = scmp.ne.s32.totalorder %s15_s7, %s62_s15  ;;  %p68_p5 = scmp.lt.s32.totalorder %s62_s15, %s62_s15 }
   0xb   :  { %p69_p6 = por %p68_p5, %p67_p4 }
   0xd   :  { %p70_p7 = pnand %p69_p6, %p63_p3 }
   0xf   :  { %73 = shalt.err (!%p70_p7)
}
  0x10   :  { %17 = dma.hbm_to_vmem [thread:$0]  %s136_s0, 256, %s15_s7, [#allocation3]  }
  0x11   :  { %96 = dma.done.wait [#allocation3], 256  }
  0x12   :  { %97 = vsyncadd [#allocation3], 4294967040  ;;  %v21_v0 = vld [vmem:[#allocation2] sm:$0xff]  ;;  %v22_v1 = vld [vmem:[#allocation2 + $0x8] sm:$0xff]  ;;  %s101_s18 = smov [#allocation5]  }
  0x13   :  { %v23_v2 = vmul.f32 0.5, %v21_v0  ;;  %v24_v3 = vmul.f32 0.5, %v22_v1  ;;  %s37_s19 = sshll.u32 %s101_s18, 4  ;;  %s38_s19 = int_to_ptr.vmem [resolvable:$true] %s37_s19 }
  0x14   :  { %s74_s20 = scalar_lea.vmem %s38_s19, 256  ;;  %p79_p9 = scmp.lt.s32.totalorder %s38_s19, %s38_s19 }
  0x15   :  { %48 = vtanh.f32 %v23_v2  ;;  %p75_p8 = scmp.ne.s32.totalorder %s38_s19, %s74_s20  ;;  %p80_p10 = scmp.lt.s32.totalorder %s74_s20, %s74_s20 }
  0x16   :  { %50 = vtanh.f32 %v24_v3 }
  0x17   :  { %p81_p11 = por %p80_p10, %p79_p9 }
  0x19   :  { %p82_p12 = pnand %p81_p11, %p75_p8 }
  0x1f   :  { %v49_v4 = vpop.eup %48 }
  0x20   :  { %v51_v5 = vpop.eup %50  ;;  %v27_v6 = vadd.f32 1.0, %v49_v4 }
  0x21   :  { %v28_v7 = vadd.f32 1.0, %v51_v5 }
  0x22   :  { %29 = vst [vmem:[#allocation5] sm:$0xff] %v27_v6 }
  0x23   :  { %30 = vst [vmem:[#allocation5 + $0x8] sm:$0xff] %v28_v7 }
  0x24   :  { %85 = shalt.err (!%p82_p12)
}
  0x25   :  { %s86_s22 = scalar_lea.hbm %s137_s1, 256 }
  0x26   :  { %p87_p13 = scmp.ne.s32.totalorder %s137_s1, %s86_s22  ;;  %p90_p0 = scmp.lt.u32.totalorder %s86_s22, %s137_s1 }
  0x28   :  { %p92_p1 = pnand %p90_p0, %p87_p13 }
  0x2a   :  { %95 = shalt.err (!%p92_p1)
}
  0x2b   :  { %40 = dma.vmem_to_hbm [thread:$0]  %s38_s19, 256, %s137_s1, [#allocation4]  }
  0x2c   :  { %98 = dma.done.wait [#allocation4], 256  }
  0x2d   :  { %99 = vsyncadd [#allocation4], 4294967040 }
  0x2e   :  { %44 = vsyncpa [#allocation3], 1 }
  0x2f   :  { %45 = vsyncpa [#allocation4], 1 }

</bundles_post_ra>
